<compile_context>
chip_gen: v7x
topology: tpu7x:2x2x1
jax: 0.10.0
libtpu: 0.0.40
codegen_flags: <defaults>
</compile_context>

<pallas_src>
import functools

import jax
import jax.numpy as jnp
from jax import lax
from jax.experimental import pallas as pl
from jax.experimental.pallas import tpu as pltpu

EPS = 1e-5  # nn.InstanceNorm2d default


def _residual_block_kernel(x_ref, w1_ref, g1_ref, b1_ref, w2_ref, g2_ref, b2_ref,
                           o_ref, pad_ref, *, H, W, pad):
    # x_ref   : (1, C, H*W)  lane-dense input block (one sample)
    # w*_ref  : (9, C, C)    one (Cout, Cin) matrix per 3x3 tap, in VMEM
    # g*/b*   : (C, 1)       InstanceNorm affine params, in VMEM
    # o_ref   : (1, C, H*W)  lane-dense output block
    # pad_ref : (C, H*W + 2*pad) VMEM scratch: flat spatial axis with a zero halo
    C = o_ref.shape[1]
    HW = H * W
    inv_hw = 1.0 / float(HW)

    # Horizontal-wrap masks for the flattened layout: a tap with column offset -1 is
    # invalid where w == 0, +1 where w == W-1.  Vertical offsets are handled by the
    # zero halo of pad_ref, so no row mask is needed.
    col = lax.broadcasted_iota(jnp.int32, (1, HW), 1) % W
    m_left = (col != 0).astype(jnp.float32)        # source column w-1 valid
    m_right = (col != (W - 1)).astype(jnp.float32)  # source column w+1 valid
    wmask = (m_left, None, m_right)                 # indexed by dx in {0,1,2}

    # Zero only the halo (the interior is fully overwritten before each conv).
    pad_ref[:, 0:pad] = jnp.zeros((C, pad), jnp.float32)
    pad_ref[:, pad + HW:pad + HW + pad] = jnp.zeros((C, pad), jnp.float32)

    def conv3x3(w_ref):
        # 3x3 "SAME" conv as 9 MXU matmuls over lane-shifted views of pad_ref.
        acc = jnp.zeros((C, HW), jnp.float32)
        for dy in range(3):
            for dx in range(3):
                start = pad + (dy - 1) * W + (dx - 1)        # static slice start
                src = pad_ref[:, start:start + HW]           # (Cin, HW)
                if wmask[dx] is not None:
                    src = src * wmask[dx]
                acc = acc + jnp.dot(w_ref[dy * 3 + dx], src,
                                    preferred_element_type=jnp.float32)
        return acc

    def instance_norm(a, g_ref, b_ref):
        # Per-channel, per-instance stats (PyTorch InstanceNorm2d training-mode
        # forward: biased variance, eps=1e-5), f32 throughout.
        mean = jnp.sum(a, axis=1, keepdims=True) * inv_hw
        cen = a - mean
        var = jnp.sum(cen * cen, axis=1, keepdims=True) * inv_hw
        return cen * lax.rsqrt(var + EPS) * g_ref[...] + b_ref[...]

    x = x_ref[0]                                             # (C, HW) f32

    # ---- conv1 + InstanceNorm + ReLU ----
    pad_ref[:, pad:pad + HW] = x
    h = jnp.maximum(instance_norm(conv3x3(w1_ref), g1_ref, b1_ref), 0.0)

    # ---- conv2 + InstanceNorm + residual add ----
    pad_ref[:, pad:pad + HW] = h
    y = instance_norm(conv3x3(w2_ref), g2_ref, b2_ref)
    o_ref[0] = (x + y).astype(o_ref.dtype)


def residual_block(x, w1, g1, b1, w2, g2, b2):
    """x: (N, C, H, W) f32; w1/w2: (C, C, 3, 3) OIHW; g*/b*: (C,)."""
    N, C, H, W = x.shape
    HW = H * W
    PAD = max(W + 1, 64)  # flat halo; >= W+1 so every tap slice stays in range

    x_flat = x.reshape(N, C, HW).astype(jnp.float32)         # contiguous -> free reshape
    # OIHW (Cout, Cin, 3, 3) -> (9, Cout, Cin): one weight matrix per tap.
    w1_t = jnp.transpose(w1, (2, 3, 0, 1)).reshape(9, C, C).astype(jnp.float32)
    w2_t = jnp.transpose(w2, (2, 3, 0, 1)).reshape(9, C, C).astype(jnp.float32)
    g1c = g1.reshape(C, 1).astype(jnp.float32)
    b1c = b1.reshape(C, 1).astype(jnp.float32)
    g2c = g2.reshape(C, 1).astype(jnp.float32)
    b2c = b2.reshape(C, 1).astype(jnp.float32)

    kernel = functools.partial(_residual_block_kernel, H=H, W=W, pad=PAD)
    full3 = lambda b: (0, 0, 0)
    full2 = lambda b: (0, 0)

    out_flat = pl.pallas_call(
        kernel,
        out_shape=jax.ShapeDtypeStruct((N, C, HW), jnp.float32),
        grid=(N,),
        in_specs=[
            pl.BlockSpec((1, C, HW), lambda b: (b, 0, 0)),   # x, one sample per step
            pl.BlockSpec((9, C, C), full3),                  # conv1 weights (VMEM)
            pl.BlockSpec((C, 1), full2),                     # IN1 gamma
            pl.BlockSpec((C, 1), full2),                     # IN1 beta
            pl.BlockSpec((9, C, C), full3),                  # conv2 weights (VMEM)
            pl.BlockSpec((C, 1), full2),                     # IN2 gamma
            pl.BlockSpec((C, 1), full2),                     # IN2 beta
        ],
        out_specs=pl.BlockSpec((1, C, HW), lambda b: (b, 0, 0)),
        scratch_shapes=[pltpu.VMEM((C, HW + 2 * PAD), jnp.float32)],
        compiler_params=pltpu.CompilerParams(
            dimension_semantics=("parallel",)),              # batch is independent
    )(x_flat, w1_t, g1c, b1c, w2_t, g2c, b2c)
    return out_flat.reshape(N, C, H, W)


# ----------------------- pure-JAX reference (for checking) -----------------------
def _instance_norm(x, g, b):
    mean = x.mean(axis=(2, 3), keepdims=True)
    var = x.var(axis=(2, 3), keepdims=True)  # biased, matches PyTorch IN forward
    xn = (x - mean) * lax.rsqrt(var + EPS)
    return xn * g[None, :, None, None] + b[None, :, None, None]


def reference(x, w1, g1, b1, w2, g2, b2):
    dn = ('NCHW', 'OIHW', 'NCHW')
    h = lax.conv_general_dilated(x, w1, (1, 1), 'SAME', dimension_numbers=dn,
                                 precision=lax.Precision.HIGHEST)
    h = jnp.maximum(_instance_norm(h, g1, b1), 0.0)
    h = lax.conv_general_dilated(h, w2, (1, 1), 'SAME', dimension_numbers=dn,
                                 precision=lax.Precision.HIGHEST)
    h = _instance_norm(h, g2, b2)
    return x + h


if __name__ == "__main__":
    # NOTE: PyTorch InstanceNorm2d(track_running_stats=True) in training mode
    # normalizes with per-instance stats (implemented here); the running-stats
    # buffer update is a training-time side effect, not part of the output.
    key = jax.random.PRNGKey(0)
    kx, k1, k2, kg1, kb1, kg2, kb2 = jax.random.split(key, 7)
    N, C, H, W = 2, 4, 16, 16           # dim_in == dim_out == 4 (residual add)
    x = jax.random.normal(kx, (N, C, H, W), jnp.float32)
    w1 = 0.2 * jax.random.normal(k1, (C, C, 3, 3), jnp.float32)
    w2 = 0.2 * jax.random.normal(k2, (C, C, 3, 3), jnp.float32)
    g1 = 1.0 + 0.1 * jax.random.normal(kg1, (C,), jnp.float32)
    b1 = 0.1 * jax.random.normal(kb1, (C,), jnp.float32)
    g2 = 1.0 + 0.1 * jax.random.normal(kg2, (C,), jnp.float32)
    b2 = 0.1 * jax.random.normal(kb2, (C,), jnp.float32)

    out = jax.block_until_ready(residual_block(x, w1, g1, b1, w2, g2, b2))
    ref = reference(x, w1, g1, b1, w2, g2, b2)
    err = float(jnp.max(jnp.abs(out - ref)))
    # Tolerance covers MXU f32 multi-pass decomposition and accumulation-order
    # differences vs. lax.conv (stats/accumulators are kept in f32 throughout).
    assert err < 1e-3, f"max abs error {err}"
    print("KERNEL_OK")
</pallas_src>

<mosaic_0001>
module attributes {stable_mosaic.version = 11 : i64} {
  func.func @_residual_block_kernel(%arg0: i32, %arg1: memref<1x4x256xf32, #tpu.memory_space<vmem>>, %arg2: memref<9x4x4xf32, #tpu.memory_space<vmem>>, %arg3: memref<4x1xf32, #tpu.memory_space<vmem>>, %arg4: memref<4x1xf32, #tpu.memory_space<vmem>>, %arg5: memref<9x4x4xf32, #tpu.memory_space<vmem>>, %arg6: memref<4x1xf32, #tpu.memory_space<vmem>>, %arg7: memref<4x1xf32, #tpu.memory_space<vmem>>, %arg8: memref<1x4x256xf32, #tpu.memory_space<vmem>>, %arg9: memref<4x384xf32, #tpu.memory_space<vmem>>) attributes {dimension_semantics = [#tpu.dimension_semantics<parallel>], iteration_bounds = array<i64: 2>, scalar_prefetch = 0 : i64, scratch_operands = 1 : i64, tpu.core_type = #tpu.core_type<tc>, window_params = [{transform_indices = @transform_0, window_bounds = array<i64: 1, 4, 256>}, {pipeline_mode = #tpu.pipeline_mode<synchronous>, transform_indices = @transform_1, window_bounds = array<i64: 9, 4, 4>}, {pipeline_mode = #tpu.pipeline_mode<synchronous>, transform_indices = @transform_2, window_bounds = array<i64: 4, 1>}, {pipeline_mode = #tpu.pipeline_mode<synchronous>, transform_indices = @transform_3, window_bounds = array<i64: 4, 1>}, {pipeline_mode = #tpu.pipeline_mode<synchronous>, transform_indices = @transform_4, window_bounds = array<i64: 9, 4, 4>}, {pipeline_mode = #tpu.pipeline_mode<synchronous>, transform_indices = @transform_5, window_bounds = array<i64: 4, 1>}, {pipeline_mode = #tpu.pipeline_mode<synchronous>, transform_indices = @transform_6, window_bounds = array<i64: 4, 1>}, {transform_indices = @transform_7, window_bounds = array<i64: 1, 4, 256>}]} {
    %0 = tpu.iota {dimensions = array<i32: 1>} : vector<1x256xi32>
    %c16_i32 = arith.constant 16 : i32
    %c0_i32 = arith.constant 0 : i32
    %1 = arith.cmpi eq, %c16_i32, %c0_i32 : i32
    %c1_i32 = arith.constant 1 : i32
    %2 = arith.select %1, %c1_i32, %c16_i32 : i32
    %3 = vector.broadcast %2 : i32 to vector<1x256xi32>
    %4 = arith.remsi %0, %3 : vector<1x256xi32>
    %c0_i32_0 = arith.constant 0 : i32
    %5 = vector.broadcast %c0_i32_0 : i32 to vector<1x256xi32>
    %6 = arith.cmpi ne, %4, %5 : vector<1x256xi32>
    %c0_i32_1 = arith.constant 0 : i32
    %7 = vector.broadcast %c0_i32_1 : i32 to vector<1x256xi32>
    %8 = arith.cmpi slt, %4, %7 : vector<1x256xi32>
    %c0_i32_2 = arith.constant 0 : i32
    %9 = arith.cmpi slt, %2, %c0_i32_2 : i32
    %10 = vector.broadcast %9 : i1 to vector<1x256xi1>
    %11 = vector.broadcast %10 : vector<1x256xi1> to vector<1x256xi1>
    %12 = arith.xori %8, %11 : vector<1x256xi1>
    %13 = arith.andi %12, %6 : vector<1x256xi1>
    %14 = vector.broadcast %2 : i32 to vector<1x256xi32>
    %15 = arith.addi %4, %14 : vector<1x256xi32>
    %16 = arith.select %13, %15, %4 : vector<1x256xi1>, vector<1x256xi32>
    %c0_i32_3 = arith.constant 0 : i32
    %17 = vector.broadcast %c0_i32_3 : i32 to vector<1x256xi32>
    %18 = arith.cmpi ne, %16, %17 : vector<1x256xi32>
    %19 = arith.extui %18 : vector<1x256xi1> to vector<1x256xi32>
    %20 = arith.sitofp %19 : vector<1x256xi32> to vector<1x256xf32>
    %c15_i32 = arith.constant 15 : i32
    %21 = vector.broadcast %c15_i32 : i32 to vector<1x256xi32>
    %22 = arith.cmpi ne, %16, %21 : vector<1x256xi32>
    %23 = arith.extui %22 : vector<1x256xi1> to vector<1x256xi32>
    %24 = arith.sitofp %23 : vector<1x256xi32> to vector<1x256xf32>
    %cst = arith.constant 0.000000e+00 : f32
    %25 = vector.broadcast %cst : f32 to vector<4x64xf32>
    %c0 = arith.constant 0 : index
    %c0_4 = arith.constant 0 : index
    %26 = vector.load %arg9[%c0, %c0_4] : memref<4x384xf32, #tpu.memory_space<vmem>>, vector<4x64xf32>
    tpu.vector_store %arg9[%c0, %c0_4], %25 {strides = array<i32>} : memref<4x384xf32, #tpu.memory_space<vmem>>, vector<4x64xf32>,
    %cst_5 = arith.constant 0.000000e+00 : f32
    %27 = vector.broadcast %cst_5 : f32 to vector<4x64xf32>
    %c0_6 = arith.constant 0 : index
    %c320 = arith.constant 320 : index
    %28 = vector.load %arg9[%c0_6, %c320] : memref<4x384xf32, #tpu.memory_space<vmem>>, vector<4x64xf32>
    tpu.vector_store %arg9[%c0_6, %c320], %27 {strides = array<i32>} : memref<4x384xf32, #tpu.memory_space<vmem>>, vector<4x64xf32>,
    %c0_7 = arith.constant 0 : index
    %c0_8 = arith.constant 0 : index
    %c0_9 = arith.constant 0 : index
    %29 = vector.load %arg1[%c0_7, %c0_8, %c0_9] : memref<1x4x256xf32, #tpu.memory_space<vmem>>, vector<1x4x256xf32>
    %30 = vector.shape_cast %29 : vector<1x4x256xf32> to vector<4x256xf32>
    %c0_10 = arith.constant 0 : index
    %c64 = arith.constant 64 : index
    %31 = vector.load %arg9[%c0_10, %c64] : memref<4x384xf32, #tpu.memory_space<vmem>>, vector<4x256xf32>
    tpu.vector_store %arg9[%c0_10, %c64], %30 {strides = array<i32>} : memref<4x384xf32, #tpu.memory_space<vmem>>, vector<4x256xf32>,
    %cst_11 = arith.constant 0.000000e+00 : f32
    %32 = vector.broadcast %cst_11 : f32 to vector<4x256xf32>
    %c0_12 = arith.constant 0 : index
    %c47 = arith.constant 47 : index
    %33 = vector.load %arg9[%c0_12, %c47] : memref<4x384xf32, #tpu.memory_space<vmem>>, vector<4x256xf32>
    %34 = vector.broadcast %20 : vector<1x256xf32> to vector<4x256xf32>
    %35 = arith.mulf %33, %34 : vector<4x256xf32>
    %c0_13 = arith.constant 0 : index
    %c0_14 = arith.constant 0 : index
    %c0_15 = arith.constant 0 : index
    %36 = vector.load %arg2[%c0_13, %c0_14, %c0_15] : memref<9x4x4xf32, #tpu.memory_space<vmem>>, vector<1x4x4xf32>
    %37 = vector.shape_cast %36 : vector<1x4x4xf32> to vector<4x4xf32>
    %cst_16 = arith.constant dense<0.000000e+00> : vector<4x256xf32>
    %38 = tpu.matmul %37, %35, %cst_16 {dimension_numbers = #tpu.dot_dimension_numbers<[1], [0], [0], [1], [0, 0, 1, 1], [], []>} : vector<4x4xf32>, vector<4x256xf32>, vector<4x256xf32> -> vector<4x256xf32>
    %39 = arith.addf %32, %38 : vector<4x256xf32>
    %c0_17 = arith.constant 0 : index
    %c48 = arith.constant 48 : index
    %40 = vector.load %arg9[%c0_17, %c48] : memref<4x384xf32, #tpu.memory_space<vmem>>, vector<4x256xf32>
    %c1 = arith.constant 1 : index
    %c0_18 = arith.constant 0 : index
    %c0_19 = arith.constant 0 : index
    %41 = vector.load %arg2[%c1, %c0_18, %c0_19] : memref<9x4x4xf32, #tpu.memory_space<vmem>>, vector<1x4x4xf32>
    %42 = vector.shape_cast %41 : vector<1x4x4xf32> to vector<4x4xf32>
    %cst_20 = arith.constant dense<0.000000e+00> : vector<4x256xf32>
    %43 = tpu.matmul %42, %40, %cst_20 {dimension_numbers = #tpu.dot_dimension_numbers<[1], [0], [0], [1], [0, 0, 1, 1], [], []>} : vector<4x4xf32>, vector<4x256xf32>, vector<4x256xf32> -> vector<4x256xf32>
    %44 = arith.addf %39, %43 : vector<4x256xf32>
    %c0_21 = arith.constant 0 : index
    %c49 = arith.constant 49 : index
    %45 = vector.load %arg9[%c0_21, %c49] : memref<4x384xf32, #tpu.memory_space<vmem>>, vector<4x256xf32>
    %46 = vector.broadcast %24 : vector<1x256xf32> to vector<4x256xf32>
    %47 = arith.mulf %45, %46 : vector<4x256xf32>
    %c2 = arith.constant 2 : index
    %c0_22 = arith.constant 0 : index
    %c0_23 = arith.constant 0 : index
    %48 = vector.load %arg2[%c2, %c0_22, %c0_23] : memref<9x4x4xf32, #tpu.memory_space<vmem>>, vector<1x4x4xf32>
    %49 = vector.shape_cast %48 : vector<1x4x4xf32> to vector<4x4xf32>
    %cst_24 = arith.constant dense<0.000000e+00> : vector<4x256xf32>
    %50 = tpu.matmul %49, %47, %cst_24 {dimension_numbers = #tpu.dot_dimension_numbers<[1], [0], [0], [1], [0, 0, 1, 1], [], []>} : vector<4x4xf32>, vector<4x256xf32>, vector<4x256xf32> -> vector<4x256xf32>
    %51 = arith.addf %44, %50 : vector<4x256xf32>
    %c0_25 = arith.constant 0 : index
    %c63 = arith.constant 63 : index
    %52 = vector.load %arg9[%c0_25, %c63] : memref<4x384xf32, #tpu.memory_space<vmem>>, vector<4x256xf32>
    %53 = vector.broadcast %20 : vector<1x256xf32> to vector<4x256xf32>
    %54 = arith.mulf %52, %53 : vector<4x256xf32>
    %c3 = arith.constant 3 : index
    %c0_26 = arith.constant 0 : index
    %c0_27 = arith.constant 0 : index
    %55 = vector.load %arg2[%c3, %c0_26, %c0_27] : memref<9x4x4xf32, #tpu.memory_space<vmem>>, vector<1x4x4xf32>
    %56 = vector.shape_cast %55 : vector<1x4x4xf32> to vector<4x4xf32>
    %cst_28 = arith.constant dense<0.000000e+00> : vector<4x256xf32>
    %57 = tpu.matmul %56, %54, %cst_28 {dimension_numbers = #tpu.dot_dimension_numbers<[1], [0], [0], [1], [0, 0, 1, 1], [], []>} : vector<4x4xf32>, vector<4x256xf32>, vector<4x256xf32> -> vector<4x256xf32>
    %58 = arith.addf %51, %57 : vector<4x256xf32>
    %c0_29 = arith.constant 0 : index
    %c64_30 = arith.constant 64 : index
    %59 = vector.load %arg9[%c0_29, %c64_30] : memref<4x384xf32, #tpu.memory_space<vmem>>, vector<4x256xf32>
    %c4 = arith.constant 4 : index
    %c0_31 = arith.constant 0 : index
    %c0_32 = arith.constant 0 : index
    %60 = vector.load %arg2[%c4, %c0_31, %c0_32] : memref<9x4x4xf32, #tpu.memory_space<vmem>>, vector<1x4x4xf32>
    %61 = vector.shape_cast %60 : vector<1x4x4xf32> to vector<4x4xf32>
    %cst_33 = arith.constant dense<0.000000e+00> : vector<4x256xf32>
    %62 = tpu.matmul %61, %59, %cst_33 {dimension_numbers = #tpu.dot_dimension_numbers<[1], [0], [0], [1], [0, 0, 1, 1], [], []>} : vector<4x4xf32>, vector<4x256xf32>, vector<4x256xf32> -> vector<4x256xf32>
    %63 = arith.addf %58, %62 : vector<4x256xf32>
    %c0_34 = arith.constant 0 : index
    %c65 = arith.constant 65 : index
    %64 = vector.load %arg9[%c0_34, %c65] : memref<4x384xf32, #tpu.memory_space<vmem>>, vector<4x256xf32>
    %65 = vector.broadcast %24 : vector<1x256xf32> to vector<4x256xf32>
    %66 = arith.mulf %64, %65 : vector<4x256xf32>
    %c5 = arith.constant 5 : index
    %c0_35 = arith.constant 0 : index
    %c0_36 = arith.constant 0 : index
    %67 = vector.load %arg2[%c5, %c0_35, %c0_36] : memref<9x4x4xf32, #tpu.memory_space<vmem>>, vector<1x4x4xf32>
    %68 = vector.shape_cast %67 : vector<1x4x4xf32> to vector<4x4xf32>
    %cst_37 = arith.constant dense<0.000000e+00> : vector<4x256xf32>
    %69 = tpu.matmul %68, %66, %cst_37 {dimension_numbers = #tpu.dot_dimension_numbers<[1], [0], [0], [1], [0, 0, 1, 1], [], []>} : vector<4x4xf32>, vector<4x256xf32>, vector<4x256xf32> -> vector<4x256xf32>
    %70 = arith.addf %63, %69 : vector<4x256xf32>
    %c0_38 = arith.constant 0 : index
    %c79 = arith.constant 79 : index
    %71 = vector.load %arg9[%c0_38, %c79] : memref<4x384xf32, #tpu.memory_space<vmem>>, vector<4x256xf32>
    %72 = vector.broadcast %20 : vector<1x256xf32> to vector<4x256xf32>
    %73 = arith.mulf %71, %72 : vector<4x256xf32>
    %c6 = arith.constant 6 : index
    %c0_39 = arith.constant 0 : index
    %c0_40 = arith.constant 0 : index
    %74 = vector.load %arg2[%c6, %c0_39, %c0_40] : memref<9x4x4xf32, #tpu.memory_space<vmem>>, vector<1x4x4xf32>
    %75 = vector.shape_cast %74 : vector<1x4x4xf32> to vector<4x4xf32>
    %cst_41 = arith.constant dense<0.000000e+00> : vector<4x256xf32>
    %76 = tpu.matmul %75, %73, %cst_41 {dimension_numbers = #tpu.dot_dimension_numbers<[1], [0], [0], [1], [0, 0, 1, 1], [], []>} : vector<4x4xf32>, vector<4x256xf32>, vector<4x256xf32> -> vector<4x256xf32>
    %77 = arith.addf %70, %76 : vector<4x256xf32>
    %c0_42 = arith.constant 0 : index
    %c80 = arith.constant 80 : index
    %78 = vector.load %arg9[%c0_42, %c80] : memref<4x384xf32, #tpu.memory_space<vmem>>, vector<4x256xf32>
    %c7 = arith.constant 7 : index
    %c0_43 = arith.constant 0 : index
    %c0_44 = arith.constant 0 : index
    %79 = vector.load %arg2[%c7, %c0_43, %c0_44] : memref<9x4x4xf32, #tpu.memory_space<vmem>>, vector<1x4x4xf32>
    %80 = vector.shape_cast %79 : vector<1x4x4xf32> to vector<4x4xf32>
    %cst_45 = arith.constant dense<0.000000e+00> : vector<4x256xf32>
    %81 = tpu.matmul %80, %78, %cst_45 {dimension_numbers = #tpu.dot_dimension_numbers<[1], [0], [0], [1], [0, 0, 1, 1], [], []>} : vector<4x4xf32>, vector<4x256xf32>, vector<4x256xf32> -> vector<4x256xf32>
    %82 = arith.addf %77, %81 : vector<4x256xf32>
    %c0_46 = arith.constant 0 : index
    %c81 = arith.constant 81 : index
    %83 = vector.load %arg9[%c0_46, %c81] : memref<4x384xf32, #tpu.memory_space<vmem>>, vector<4x256xf32>
    %84 = vector.broadcast %24 : vector<1x256xf32> to vector<4x256xf32>
    %85 = arith.mulf %83, %84 : vector<4x256xf32>
    %c8 = arith.constant 8 : index
    %c0_47 = arith.constant 0 : index
    %c0_48 = arith.constant 0 : index
    %86 = vector.load %arg2[%c8, %c0_47, %c0_48] : memref<9x4x4xf32, #tpu.memory_space<vmem>>, vector<1x4x4xf32>
    %87 = vector.shape_cast %86 : vector<1x4x4xf32> to vector<4x4xf32>
    %cst_49 = arith.constant dense<0.000000e+00> : vector<4x256xf32>
    %88 = tpu.matmul %87, %85, %cst_49 {dimension_numbers = #tpu.dot_dimension_numbers<[1], [0], [0], [1], [0, 0, 1, 1], [], []>} : vector<4x4xf32>, vector<4x256xf32>, vector<4x256xf32> -> vector<4x256xf32>
    %89 = arith.addf %82, %88 : vector<4x256xf32>
    %cst_50 = arith.constant dense<0.000000e+00> : vector<4xf32>
    %90 = vector.multi_reduction <add>, %89, %cst_50 [1] : vector<4x256xf32> to vector<4xf32>
    %91 = vector.shape_cast %90 : vector<4xf32> to vector<4x1xf32>
    %cst_51 = arith.constant 3.906250e-03 : f32
    %92 = vector.broadcast %cst_51 : f32 to vector<4x1xf32>
    %93 = arith.mulf %91, %92 : vector<4x1xf32>
    %94 = vector.broadcast %93 : vector<4x1xf32> to vector<4x256xf32>
    %95 = arith.subf %89, %94 : vector<4x256xf32>
    %96 = arith.mulf %95, %95 : vector<4x256xf32>
    %cst_52 = arith.constant dense<0.000000e+00> : vector<4xf32>
    %97 = vector.multi_reduction <add>, %96, %cst_52 [1] : vector<4x256xf32> to vector<4xf32>
    %98 = vector.shape_cast %97 : vector<4xf32> to vector<4x1xf32>
    %cst_53 = arith.constant 3.906250e-03 : f32
    %99 = vector.broadcast %cst_53 : f32 to vector<4x1xf32>
    %100 = arith.mulf %98, %99 : vector<4x1xf32>
    %cst_54 = arith.constant 9.99999974E-6 : f32
    %101 = vector.broadcast %cst_54 : f32 to vector<4x1xf32>
    %102 = arith.addf %100, %101 : vector<4x1xf32>
    %103 = math.rsqrt %102 : vector<4x1xf32>
    %104 = vector.broadcast %103 : vector<4x1xf32> to vector<4x256xf32>
    %105 = arith.mulf %95, %104 : vector<4x256xf32>
    %c0_55 = arith.constant 0 : index
    %c0_56 = arith.constant 0 : index
    %106 = vector.load %arg3[%c0_55, %c0_56] : memref<4x1xf32, #tpu.memory_space<vmem>>, vector<4x1xf32>
    %107 = vector.broadcast %106 : vector<4x1xf32> to vector<4x256xf32>
    %108 = arith.mulf %105, %107 : vector<4x256xf32>
    %c0_57 = arith.constant 0 : index
    %c0_58 = arith.constant 0 : index
    %109 = vector.load %arg4[%c0_57, %c0_58] : memref<4x1xf32, #tpu.memory_space<vmem>>, vector<4x1xf32>
    %110 = vector.broadcast %109 : vector<4x1xf32> to vector<4x256xf32>
    %111 = arith.addf %108, %110 : vector<4x256xf32>
    %cst_59 = arith.constant 0.000000e+00 : f32
    %112 = vector.broadcast %cst_59 : f32 to vector<4x256xf32>
    %113 = arith.maximumf %111, %112 : vector<4x256xf32>
    %c0_60 = arith.constant 0 : index
    %c64_61 = arith.constant 64 : index
    %114 = vector.load %arg9[%c0_60, %c64_61] : memref<4x384xf32, #tpu.memory_space<vmem>>, vector<4x256xf32>
    tpu.vector_store %arg9[%c0_60, %c64_61], %113 {strides = array<i32>} : memref<4x384xf32, #tpu.memory_space<vmem>>, vector<4x256xf32>,
    %cst_62 = arith.constant 0.000000e+00 : f32
    %115 = vector.broadcast %cst_62 : f32 to vector<4x256xf32>
    %c0_63 = arith.constant 0 : index
    %c47_64 = arith.constant 47 : index
    %116 = vector.load %arg9[%c0_63, %c47_64] : memref<4x384xf32, #tpu.memory_space<vmem>>, vector<4x256xf32>
    %117 = vector.broadcast %20 : vector<1x256xf32> to vector<4x256xf32>
    %118 = arith.mulf %116, %117 : vector<4x256xf32>
    %c0_65 = arith.constant 0 : index
    %c0_66 = arith.constant 0 : index
    %c0_67 = arith.constant 0 : index
    %119 = vector.load %arg5[%c0_65, %c0_66, %c0_67] : memref<9x4x4xf32, #tpu.memory_space<vmem>>, vector<1x4x4xf32>
    %120 = vector.shape_cast %119 : vector<1x4x4xf32> to vector<4x4xf32>
    %cst_68 = arith.constant dense<0.000000e+00> : vector<4x256xf32>
    %121 = tpu.matmul %120, %118, %cst_68 {dimension_numbers = #tpu.dot_dimension_numbers<[1], [0], [0], [1], [0, 0, 1, 1], [], []>} : vector<4x4xf32>, vector<4x256xf32>, vector<4x256xf32> -> vector<4x256xf32>
    %122 = arith.addf %115, %121 : vector<4x256xf32>
    %c0_69 = arith.constant 0 : index
    %c48_70 = arith.constant 48 : index
    %123 = vector.load %arg9[%c0_69, %c48_70] : memref<4x384xf32, #tpu.memory_space<vmem>>, vector<4x256xf32>
    %c1_71 = arith.constant 1 : index
    %c0_72 = arith.constant 0 : index
    %c0_73 = arith.constant 0 : index
    %124 = vector.load %arg5[%c1_71, %c0_72, %c0_73] : memref<9x4x4xf32, #tpu.memory_space<vmem>>, vector<1x4x4xf32>
    %125 = vector.shape_cast %124 : vector<1x4x4xf32> to vector<4x4xf32>
    %cst_74 = arith.constant dense<0.000000e+00> : vector<4x256xf32>
    %126 = tpu.matmul %125, %123, %cst_74 {dimension_numbers = #tpu.dot_dimension_numbers<[1], [0], [0], [1], [0, 0, 1, 1], [], []>} : vector<4x4xf32>, vector<4x256xf32>, vector<4x256xf32> -> vector<4x256xf32>
    %127 = arith.addf %122, %126 : vector<4x256xf32>
    %c0_75 = arith.constant 0 : index
    %c49_76 = arith.constant 49 : index
    %128 = vector.load %arg9[%c0_75, %c49_76] : memref<4x384xf32, #tpu.memory_space<vmem>>, vector<4x256xf32>
    %129 = vector.broadcast %24 : vector<1x256xf32> to vector<4x256xf32>
    %130 = arith.mulf %128, %129 : vector<4x256xf32>
    %c2_77 = arith.constant 2 : index
    %c0_78 = arith.constant 0 : index
    %c0_79 = arith.constant 0 : index
    %131 = vector.load %arg5[%c2_77, %c0_78, %c0_79] : memref<9x4x4xf32, #tpu.memory_space<vmem>>, vector<1x4x4xf32>
    %132 = vector.shape_cast %131 : vector<1x4x4xf32> to vector<4x4xf32>
    %cst_80 = arith.constant dense<0.000000e+00> : vector<4x256xf32>
    %133 = tpu.matmul %132, %130, %cst_80 {dimension_numbers = #tpu.dot_dimension_numbers<[1], [0], [0], [1], [0, 0, 1, 1], [], []>} : vector<4x4xf32>, vector<4x256xf32>, vector<4x256xf32> -> vector<4x256xf32>
    %134 = arith.addf %127, %133 : vector<4x256xf32>
    %c0_81 = arith.constant 0 : index
    %c63_82 = arith.constant 63 : index
    %135 = vector.load %arg9[%c0_81, %c63_82] : memref<4x384xf32, #tpu.memory_space<vmem>>, vector<4x256xf32>
    %136 = vector.broadcast %20 : vector<1x256xf32> to vector<4x256xf32>
    %137 = arith.mulf %135, %136 : vector<4x256xf32>
    %c3_83 = arith.constant 3 : index
    %c0_84 = arith.constant 0 : index
    %c0_85 = arith.constant 0 : index
    %138 = vector.load %arg5[%c3_83, %c0_84, %c0_85] : memref<9x4x4xf32, #tpu.memory_space<vmem>>, vector<1x4x4xf32>
    %139 = vector.shape_cast %138 : vector<1x4x4xf32> to vector<4x4xf32>
    %cst_86 = arith.constant dense<0.000000e+00> : vector<4x256xf32>
    %140 = tpu.matmul %139, %137, %cst_86 {dimension_numbers = #tpu.dot_dimension_numbers<[1], [0], [0], [1], [0, 0, 1, 1], [], []>} : vector<4x4xf32>, vector<4x256xf32>, vector<4x256xf32> -> vector<4x256xf32>
    %141 = arith.addf %134, %140 : vector<4x256xf32>
    %c0_87 = arith.constant 0 : index
    %c64_88 = arith.constant 64 : index
    %142 = vector.load %arg9[%c0_87, %c64_88] : memref<4x384xf32, #tpu.memory_space<vmem>>, vector<4x256xf32>
    %c4_89 = arith.constant 4 : index
    %c0_90 = arith.constant 0 : index
    %c0_91 = arith.constant 0 : index
    %143 = vector.load %arg5[%c4_89, %c0_90, %c0_91] : memref<9x4x4xf32, #tpu.memory_space<vmem>>, vector<1x4x4xf32>
    %144 = vector.shape_cast %143 : vector<1x4x4xf32> to vector<4x4xf32>
    %cst_92 = arith.constant dense<0.000000e+00> : vector<4x256xf32>
    %145 = tpu.matmul %144, %142, %cst_92 {dimension_numbers = #tpu.dot_dimension_numbers<[1], [0], [0], [1], [0, 0, 1, 1], [], []>} : vector<4x4xf32>, vector<4x256xf32>, vector<4x256xf32> -> vector<4x256xf32>
    %146 = arith.addf %141, %145 : vector<4x256xf32>
    %c0_93 = arith.constant 0 : index
    %c65_94 = arith.constant 65 : index
    %147 = vector.load %arg9[%c0_93, %c65_94] : memref<4x384xf32, #tpu.memory_space<vmem>>, vector<4x256xf32>
    %148 = vector.broadcast %24 : vector<1x256xf32> to vector<4x256xf32>
    %149 = arith.mulf %147, %148 : vector<4x256xf32>
    %c5_95 = arith.constant 5 : index
    %c0_96 = arith.constant 0 : index
    %c0_97 = arith.constant 0 : index
    %150 = vector.load %arg5[%c5_95, %c0_96, %c0_97] : memref<9x4x4xf32, #tpu.memory_space<vmem>>, vector<1x4x4xf32>
    %151 = vector.shape_cast %150 : vector<1x4x4xf32> to vector<4x4xf32>
    %cst_98 = arith.constant dense<0.000000e+00> : vector<4x256xf32>
    %152 = tpu.matmul %151, %149, %cst_98 {dimension_numbers = #tpu.dot_dimension_numbers<[1], [0], [0], [1], [0, 0, 1, 1], [], []>} : vector<4x4xf32>, vector<4x256xf32>, vector<4x256xf32> -> vector<4x256xf32>
    %153 = arith.addf %146, %152 : vector<4x256xf32>
    %c0_99 = arith.constant 0 : index
    %c79_100 = arith.constant 79 : index
    %154 = vector.load %arg9[%c0_99, %c79_100] : memref<4x384xf32, #tpu.memory_space<vmem>>, vector<4x256xf32>
    %155 = vector.broadcast %20 : vector<1x256xf32> to vector<4x256xf32>
    %156 = arith.mulf %154, %155 : vector<4x256xf32>
    %c6_101 = arith.constant 6 : index
    %c0_102 = arith.constant 0 : index
    %c0_103 = arith.constant 0 : index
    %157 = vector.load %arg5[%c6_101, %c0_102, %c0_103] : memref<9x4x4xf32, #tpu.memory_space<vmem>>, vector<1x4x4xf32>
    %158 = vector.shape_cast %157 : vector<1x4x4xf32> to vector<4x4xf32>
    %cst_104 = arith.constant dense<0.000000e+00> : vector<4x256xf32>
    %159 = tpu.matmul %158, %156, %cst_104 {dimension_numbers = #tpu.dot_dimension_numbers<[1], [0], [0], [1], [0, 0, 1, 1], [], []>} : vector<4x4xf32>, vector<4x256xf32>, vector<4x256xf32> -> vector<4x256xf32>
    %160 = arith.addf %153, %159 : vector<4x256xf32>
    %c0_105 = arith.constant 0 : index
    %c80_106 = arith.constant 80 : index
    %161 = vector.load %arg9[%c0_105, %c80_106] : memref<4x384xf32, #tpu.memory_space<vmem>>, vector<4x256xf32>
    %c7_107 = arith.constant 7 : index
    %c0_108 = arith.constant 0 : index
    %c0_109 = arith.constant 0 : index
    %162 = vector.load %arg5[%c7_107, %c0_108, %c0_109] : memref<9x4x4xf32, #tpu.memory_space<vmem>>, vector<1x4x4xf32>
    %163 = vector.shape_cast %162 : vector<1x4x4xf32> to vector<4x4xf32>
    %cst_110 = arith.constant dense<0.000000e+00> : vector<4x256xf32>
    %164 = tpu.matmul %163, %161, %cst_110 {dimension_numbers = #tpu.dot_dimension_numbers<[1], [0], [0], [1], [0, 0, 1, 1], [], []>} : vector<4x4xf32>, vector<4x256xf32>, vector<4x256xf32> -> vector<4x256xf32>
    %165 = arith.addf %160, %164 : vector<4x256xf32>
    %c0_111 = arith.constant 0 : index
    %c81_112 = arith.constant 81 : index
    %166 = vector.load %arg9[%c0_111, %c81_112] : memref<4x384xf32, #tpu.memory_space<vmem>>, vector<4x256xf32>
    %167 = vector.broadcast %24 : vector<1x256xf32> to vector<4x256xf32>
    %168 = arith.mulf %166, %167 : vector<4x256xf32>
    %c8_113 = arith.constant 8 : index
    %c0_114 = arith.constant 0 : index
    %c0_115 = arith.constant 0 : index
    %169 = vector.load %arg5[%c8_113, %c0_114, %c0_115] : memref<9x4x4xf32, #tpu.memory_space<vmem>>, vector<1x4x4xf32>
    %170 = vector.shape_cast %169 : vector<1x4x4xf32> to vector<4x4xf32>
    %cst_116 = arith.constant dense<0.000000e+00> : vector<4x256xf32>
    %171 = tpu.matmul %170, %168, %cst_116 {dimension_numbers = #tpu.dot_dimension_numbers<[1], [0], [0], [1], [0, 0, 1, 1], [], []>} : vector<4x4xf32>, vector<4x256xf32>, vector<4x256xf32> -> vector<4x256xf32>
    %172 = arith.addf %165, %171 : vector<4x256xf32>
    %cst_117 = arith.constant dense<0.000000e+00> : vector<4xf32>
    %173 = vector.multi_reduction <add>, %172, %cst_117 [1] : vector<4x256xf32> to vector<4xf32>
    %174 = vector.shape_cast %173 : vector<4xf32> to vector<4x1xf32>
    %cst_118 = arith.constant 3.906250e-03 : f32
    %175 = vector.broadcast %cst_118 : f32 to vector<4x1xf32>
    %176 = arith.mulf %174, %175 : vector<4x1xf32>
    %177 = vector.broadcast %176 : vector<4x1xf32> to vector<4x256xf32>
    %178 = arith.subf %172, %177 : vector<4x256xf32>
    %179 = arith.mulf %178, %178 : vector<4x256xf32>
    %cst_119 = arith.constant dense<0.000000e+00> : vector<4xf32>
    %180 = vector.multi_reduction <add>, %179, %cst_119 [1] : vector<4x256xf32> to vector<4xf32>
    %181 = vector.shape_cast %180 : vector<4xf32> to vector<4x1xf32>
    %cst_120 = arith.constant 3.906250e-03 : f32
    %182 = vector.broadcast %cst_120 : f32 to vector<4x1xf32>
    %183 = arith.mulf %181, %182 : vector<4x1xf32>
    %cst_121 = arith.constant 9.99999974E-6 : f32
    %184 = vector.broadcast %cst_121 : f32 to vector<4x1xf32>
    %185 = arith.addf %183, %184 : vector<4x1xf32>
    %186 = math.rsqrt %185 : vector<4x1xf32>
    %187 = vector.broadcast %186 : vector<4x1xf32> to vector<4x256xf32>
    %188 = arith.mulf %178, %187 : vector<4x256xf32>
    %c0_122 = arith.constant 0 : index
    %c0_123 = arith.constant 0 : index
    %189 = vector.load %arg6[%c0_122, %c0_123] : memref<4x1xf32, #tpu.memory_space<vmem>>, vector<4x1xf32>
    %190 = vector.broadcast %189 : vector<4x1xf32> to vector<4x256xf32>
    %191 = arith.mulf %188, %190 : vector<4x256xf32>
    %c0_124 = arith.constant 0 : index
    %c0_125 = arith.constant 0 : index
    %192 = vector.load %arg7[%c0_124, %c0_125] : memref<4x1xf32, #tpu.memory_space<vmem>>, vector<4x1xf32>
    %193 = vector.broadcast %192 : vector<4x1xf32> to vector<4x256xf32>
    %194 = arith.addf %191, %193 : vector<4x256xf32>
    %195 = arith.addf %30, %194 : vector<4x256xf32>
    %c0_126 = arith.constant 0 : index
    %c0_127 = arith.constant 0 : index
    %c0_128 = arith.constant 0 : index
    %196 = vector.load %arg8[%c0_126, %c0_127, %c0_128] : memref<1x4x256xf32, #tpu.memory_space<vmem>>, vector<1x4x256xf32>
    %197 = vector.shape_cast %196 : vector<1x4x256xf32> to vector<4x256xf32>
    %198 = vector.shape_cast %195 : vector<4x256xf32> to vector<1x4x256xf32>
    tpu.vector_store %arg8[%c0_126, %c0_127, %c0_128], %198 {strides = array<i32>} : memref<1x4x256xf32, #tpu.memory_space<vmem>>, vector<1x4x256xf32>,
    return
  }
  func.func @transform_0(%arg0: i32) -> (i32, i32, i32) {
    %c0_i32 = arith.constant 0 : i32
    %c0_i32_0 = arith.constant 0 : i32
    %c0_i32_1 = arith.constant 0 : i32
    return %arg0, %c0_i32, %c0_i32_0 : i32, i32, i32
  }
  func.func @transform_1(%arg0: i32) -> (i32, i32, i32) {
    %c0_i32 = arith.constant 0 : i32
    %c0_i32_0 = arith.constant 0 : i32
    %c0_i32_1 = arith.constant 0 : i32
    %c0_i32_2 = arith.constant 0 : i32
    return %c0_i32, %c0_i32_0, %c0_i32_1 : i32, i32, i32
  }
  func.func @transform_2(%arg0: i32) -> (i32, i32) {
    %c0_i32 = arith.constant 0 : i32
    %c0_i32_0 = arith.constant 0 : i32
    %c0_i32_1 = arith.constant 0 : i32
    return %c0_i32, %c0_i32_0 : i32, i32
  }
  func.func @transform_3(%arg0: i32) -> (i32, i32) {
    %c0_i32 = arith.constant 0 : i32
    %c0_i32_0 = arith.constant 0 : i32
    %c0_i32_1 = arith.constant 0 : i32
    return %c0_i32, %c0_i32_0 : i32, i32
  }
  func.func @transform_4(%arg0: i32) -> (i32, i32, i32) {
    %c0_i32 = arith.constant 0 : i32
    %c0_i32_0 = arith.constant 0 : i32
    %c0_i32_1 = arith.constant 0 : i32
    %c0_i32_2 = arith.constant 0 : i32
    return %c0_i32, %c0_i32_0, %c0_i32_1 : i32, i32, i32
  }
  func.func @transform_5(%arg0: i32) -> (i32, i32) {
    %c0_i32 = arith.constant 0 : i32
    %c0_i32_0 = arith.constant 0 : i32
    %c0_i32_1 = arith.constant 0 : i32
    return %c0_i32, %c0_i32_0 : i32, i32
  }
  func.func @transform_6(%arg0: i32) -> (i32, i32) {
    %c0_i32 = arith.constant 0 : i32
    %c0_i32_0 = arith.constant 0 : i32
    %c0_i32_1 = arith.constant 0 : i32
    return %c0_i32, %c0_i32_0 : i32, i32
  }
  func.func @transform_7(%arg0: i32) -> (i32, i32, i32) {
    %c0_i32 = arith.constant 0 : i32
    %c0_i32_0 = arith.constant 0 : i32
    %c0_i32_1 = arith.constant 0 : i32
    return %arg0, %c0_i32, %c0_i32_0 : i32, i32, i32
  }
}

</mosaic_0001>

<bundles_post_ra>
// kernel: tpu_custom_call.1
= control target key start
LH: loop header
LB: loop body
LE: loop exit
PB: predicated region body
PF: predicated region fallthrough
CT: control target
= control target key end

     0   :  { %12 = vsyncpa [#allocation4], 0  ;;  %s3006_s0 = inlined_call_operand.vmem [shape: f32[2,4,256], index: 0, kind: input, shape index: {}]   ;;  %s3007_s1 = inlined_call_operand.vmem [shape: f32[9,4,4], index: 1, kind: input, shape index: {}]   ;;  %s3008_s2 = inlined_call_operand.vmem [shape: f32[4,1], index: 2, kind: input, shape index: {}]   ;;  %s3009_s3 = inlined_call_operand.vmem [shape: f32[4,1], index: 3, kind: input, shape index: {}]   ;;  %s3010_s4 = inlined_call_operand.vmem [shape: f32[9,4,4], index: 4, kind: input, shape index: {}]   ;;  %s3011_s5 = inlined_call_operand.vmem [shape: f32[4,1], index: 5, kind: input, shape index: {}]   ;;  %s3012_s6 = inlined_call_operand.vmem [shape: f32[4,1], index: 6, kind: input, shape index: {}]   ;;  %s3013_s7 = inlined_call_operand.hbm [shape: f32[2,4,256], index: 7, kind: output, shape index: {}]  }
   0x1   :  { %14 = vsyncpa [#allocation4 + $0x1], 0  ;;  %s2564_s24 = smov 0   ;;  %s2566_s25 = smov 0  }
   0x2   :  { %s2568_s26 = smov 0   ;;  %s2570_s27 = smov 0  }
   0x3 LB: > { %s2585_s28 = sadd.s32 4294967295, %s2510_s27   ;;  %s2270_s29 = sadd.s32 4294967294, %s2510_s27   ;;  %s2510_s27 = sphi %s2570_s27, %s3021_s27   ;;  %s2506_s26 = sphi %s2568_s26, %s3020_s26   ;;  %s2502_s25 = sphi %s2566_s25, %s3019_s25   ;;  %s2498_s24 = sphi %s2564_s24, %s3018_s24  }
   0x4   : > { %s2589_s30 = sadd.s32 1, %s2510_s27   ;;  %s179_s8 = sadd.s32 1, %s2506_s26 }
   0x5   : > { %s176_s9 = ssub.s32 %s2510_s27, %s2589_s30  ;;  %p189_p0 = scmp.ne.s32.totalorder %s2506_s26, %s2502_s25 }
   0x6   : > { %p177_p1 = scmp.eq.s32.totalorder %s176_s9, 0  ;;  %p190_p2 = scmp.eq.s32.totalorder %s2585_s28, 1 }
   0x7   : > { %p195_p3 = scmp.ne.s32.totalorder %s2502_s25, %s2498_s24  ;;  %p196_p4 = scmp.eq.s32.totalorder %s2270_s29, 1 }
   0x8   : > { %s2600_s10 = scalar_select %p177_p1, %s2506_s26, %s179_s8  }
   0x9   : > { %p2602_p5 = por %p190_p2, %p189_p0  ;;  %p2606_p6 = por %p196_p4, %p195_p3 }
   0xa   : > { %p2273_p7 = scmp.ge.s32.totalorder %s2510_s27, 1  ;;  %p240_p8 = scmp.lt.s32.totalorder %s2510_s27, 3 }
   0xc   : > { %p241_p9 = pnand %p2273_p7, %p240_p8 }
   0xd   : > { %p272_p10 = scmp.lt.s32.totalorder (!%p241_p9), %s2585_s28, 1  ;;  %v277_v0 = vlaneseq (!%p241_p9)  ;;  %vm316_vm0 = vcmask (!%p241_p9), 519168   ;;  %vm318_vm1 = vcmask (!%p241_p9), 1043968   ;;  %v2512_v1 = vmov (!%p241_p9), 0.0   ;;  %s2513_s18 = smov (!%p241_p9), 64  }
   0xe   : > { %244 = sbr.rel (%p241_p9) target bundleno = 1736 (0x6c8), region = 48  ;;  %317 = vst.msk [vmem:[#allocation2] sm:$0xf] (!%p241_p9), %vm316_vm0, %v2512_v1  ;;  %435 = vmatprep.mubr.f32.mxu0 (!%p241_p9), %v2512_v1  ;;  %1383 = vmatprep.mubr.f32.mxu1 (!%p241_p9), %v2512_v1  ;;  %s2514_s19 = smov (!%p241_p9), 49   ;;  %vm329_vm6 = vcmask (!%p241_p9), 1047556   ;;  %vm325_vm7 = vcmask (!%p241_p9), 523264  }
   0xf   : > { %319 = vst.msk [vmem:[#allocation2 + $0x8] sm:$0xf] (!%p241_p9), %vm318_vm1, %v2512_v1  ;;  %v278_v2 = vand.u32 (!%p241_p9), 127, %v277_v0  ;;  %s2515_s20 = smov (!%p241_p9), 47   ;;  %s2516_s21 = smov (!%p241_p9), 63   ;;  %vm2638_vm8 = vmor (!%p241_p9), %vm329_vm6, %vm318_vm1  ;;  %vm341_vm9 = vcmask (!%p241_p9), 384000  }
  0x10   : > { %s2517_s22 = smov (!%p241_p9), 65   ;;  %s2518_s23 = smov (!%p241_p9), 79   ;;  %vm540_vm10 = vcmask (!%p241_p9), 400384   ;;  %vm645_vm11 = vcmask (!%p241_p9), 515072   ;;  %vm662_vm12 = vcmask (!%p241_p9), 531456   ;;  %vm557_vm13 = vcmask (!%p241_p9), 646144  }
  0x11   : > { %v279_v3 = vadd.s32 (!%p241_p9), 128, %v278_v2  ;;  %v284_v4 = vand.u32 (!%p241_p9), 15, %v278_v2  ;;  %s2519_s29 = smov (!%p241_p9), 81   ;;  %s2520_s8 = smov (!%p241_p9), 80   ;;  %vm451_vm14 = vcmask (!%p241_p9), 662528   ;;  %vm359_vm15 = vcmask (!%p241_p9), 654336  }
  0x12   : > { %s2521_s9 = smov (!%p241_p9), 48   ;;  %vm366_vm1 = vcmask (!%p241_p9), 1043456   ;;  %s2357_s16 = sshll.u32 (!%p241_p9), %s2585_s28, 7 }
  0x13   : > { %v291_v6 = vand.u32 (!%p241_p9), 15, %v279_v3  ;;  %vm310_vm2 = vcmp.ne.s32.totalorder (!%p241_p9), %v284_v4, 15  ;;  %vm304_vm3 = vcmp.ne.s32.totalorder (!%p241_p9), %v284_v4, 0 }
  0x14   : > { %v2279_v7 = vsel (!%p241_p9), %vm310_vm2, 1.0, %v2512_v1  ;;  %v2277_v8 = vsel (!%p241_p9), %vm304_vm3, 1.0, %v2512_v1  ;;  %vm362_vm2 = vcmask (!%p241_p9), 31744   ;;  %vm1059_vm3 = vcmask (!%p241_p9), 392192  }
  0x15   : > { %s273_s13 = scalar_select %p272_p10, %s2585_s28, 1  ;;  %vm311_vm4 = vcmp.ne.s32.totalorder %v291_v6, 15  ;;  %vm305_vm5 = vcmp.ne.s32.totalorder %v291_v6, 0  ;;  %v2281_v6 = vld [vmem:[%s3007_s1 + $0x4] sm:$0xf] }
  0x16   : > { %v2280_v9 = vsel %vm311_vm4, 1.0, %v2512_v1  ;;  %v2278_v10 = vsel %vm305_vm5, 1.0, %v2512_v1  ;;  %s2523_s28 = smov [#allocation3]  }
  0x17   : > { %s2356_s14 = sshll.u32 %s273_s13, 3  ;;  %v536_v11 = vcombine.low %v2279_v7, %v2280_v9  ;;  %v337_v12 = vcombine.low %v2277_v8, %v2278_v10 }
  0x18   : > { %s276_s17 = scalar_lea.vmem %s3006_s0, %s2356_s14 }
  0x19   : > { %v2623_v5 = vld [vmem:[%s276_s17] sm:$0xff]  ;;  %537 = vrot.lane.b32.xlu1 %v536_v11, %s2514_s19 }
  0x1a   : > { %322 = vrot.lane.b32.xlu0 %v2623_v5, %s2513_s18 }
  0x1d   : > { %642 = vrot.lane.b32.xlu1 %v337_v12, %s2516_s21 }
  0x1e   : > { %338 = vrot.lane.b32.xlu0 %v337_v12, %s2515_s20 }
  0x21   : > { %945 = vrot.lane.b32.xlu1 %v337_v12, %s2518_s23 }
  0x22   : > { %842 = vrot.lane.b32.xlu0 %v536_v11, %s2517_s22 }
  0x26   : > { %1144 = vrot.lane.b32.xlu0 %v536_v11, %s2519_s29 }
  0x8b   : > { %v538_v18 = vpop.permute.xlu1 %537 }
  0x8c   : > { %v323_v13 = vpop.permute.xlu0 %322  ;;  %v2659_v26 = vrot.slane %v538_v18, 4 }
  0x8d   : > { %v324_v15 = vrot.slane %v323_v13, 4 }
  0x8e   : > { %v2667_v29 = vsel %vm540_vm10, %v2659_v26, %v538_v18 }
  0x8f   : > { %v326_v16 = vsel %vm325_vm7, %v324_v15, %v323_v13  ;;  %332 = vst.msk [vmem:[#allocation2 + $0x8] sm:$0xf] %vm316_vm0, %v324_v15  ;;  %v643_v24 = vpop.permute.xlu1 %642  ;;  %v347_v15 = vld [vmem:[%s3007_s1] sm:$0xf] }
  0x90   : > { %331 = vst.msk [vmem:[#allocation2] sm:$0xff] %vm2638_vm8, %v326_v16  ;;  %v339_v17 = vpop.permute.xlu0 %338  ;;  %v2661_v28 = vrot.slane %v643_v24, 4 }
  0x91   : > { %v2646_v19 = vrot.slane %v339_v17, 4 }
  0x92   : > { %v2671_v30 = vsel %vm645_vm11, %v2661_v28, %v643_v24  ;;  %v2288_v24 = vld [vmem:[%s3007_s1 + $0x8] sm:$0xf] }
  0x93   : > { %v2650_v20 = vsel %vm341_vm9, %v2646_v19, %v339_v17  ;;  %v946_v44 = vpop.permute.xlu1 %945 }
  0x94   : > { %v843_v36 = vpop.permute.xlu0 %842  ;;  %v2699_v46 = vrot.slane %v946_v44, 4 }
  0x95   : > { %v2684_v39 = vrot.slane %v843_v36, 4 }
  0x96   : > { %v334_v21 = vld [vmem:[#allocation2 + $0x8] sm:$0xf]  ;;  %v2705_v48 = vsel %vm557_vm13, %v2699_v46, %v946_v44  ;;  %v2296_v44 = vld [vmem:[%s3007_s1 + $0x10] sm:$0xf] }
  0x97   : > { %v2652_v22 = vld [vmem:[#allocation2] sm:$0xff]  ;;  %357 = vrot.lane.b32.xlu0 %v334_v21, %s2520_s8  ;;  %v533_v31 = vld [vmem:[#allocation2 + $0x8] sm:$0xf]  ;;  %v346_v33 = vmul.f32 %v2646_v19, %v334_v21  ;;  %v2690_v41 = vsel %vm662_vm12, %v2684_v39, %v843_v36  ;;  %v2292_v36 = vld [vmem:[%s3007_s1 + $0xc] sm:$0xf] }
  0x98   : > { %v345_v23 = vmul.f32 %v2652_v22, %v2650_v20  ;;  %v352_v25 = vcombine.high %v2652_v22, %v2652_v22  ;;  %v544_v32 = vmul.f32 %v2667_v29, %v2652_v22  ;;  %v649_v34 = vmul.f32 %v2671_v30, %v2652_v22  ;;  %v641_v40 = vld [vmem:[#allocation2 + $0x8] sm:$0xf]  ;;  %v1145_v54 = vpop.permute.xlu0 %1144 }
  0x99   : > { %v545_v35 = vmul.f32 %v2659_v26, %v533_v31  ;;  %v650_v42 = vmul.f32 %v2661_v28, %v641_v40  ;;  %v848_v43 = vmul.f32 %v2690_v41, %v2652_v22  ;;  %v746_v45 = vld [vmem:[#allocation2 + $0x8] sm:$0xf]  ;;  %v951_v50 = vmul.f32 %v2705_v48, %v2652_v22 }
  0x9a   : > { %v444_v27 = vcombine.high %v345_v23, %v345_v23  ;;  %355 = vrot.lane.b32.xlu1 %v352_v25, %s2520_s8  ;;  %v550_v37 = vcombine.high %v544_v32, %v544_v32  ;;  %v655_v38 = vcombine.high %v649_v34, %v649_v34  ;;  %v841_v49 = vld [vmem:[#allocation2 + $0x8] sm:$0xf]  ;;  %v2716_v56 = vrot.slane %v1145_v54, 4 }
  0x9b   : > { %v854_v47 = vcombine.high %v848_v43, %v848_v43  ;;  %v849_v51 = vmul.f32 %v2684_v39, %v841_v49  ;;  %v944_v52 = vld [vmem:[#allocation2 + $0x8] sm:$0xf]  ;;  %v957_v55 = vcombine.high %v951_v50, %v951_v50 }
  0x9c   : > { %447 = vrot.lane.b32.xlu0 %v444_v27, %s2519_s29  ;;  %v952_v53 = vmul.f32 %v2699_v46, %v944_v52  ;;  %v2722_v57 = vsel %vm451_vm14, %v2716_v56, %v1145_v54  ;;  %v1143_v59 = vld [vmem:[#allocation2 + $0x8] sm:$0xf]  ;;  %v2300_v52 = vld [vmem:[%s3007_s1 + $0x14] sm:$0xf] }
  0x9d   : > { %v1150_v58 = vmul.f32 %v2722_v57, %v2652_v22  ;;  %v1047_v60 = vld [vmem:[#allocation2 + $0x8] sm:$0xf]  ;;  %v1151_v61 = vmul.f32 %v2716_v56, %v1143_v59  ;;  %v2304_v59 = vld [vmem:[%s3007_s1 + $0x18] sm:$0xf] }
  0x9e   : > { %353 = vrot.lane.b32.xlu1 %v2652_v22, %s2520_s8 }
  0x9f   : > { %v1156_v62 = vcombine.high %v1150_v58, %v1150_v58 }
  0xa0   : > { %445 = vrot.lane.b32.xlu0 %v345_v23, %s2519_s29 }
  0xa2   : > { %449 = vrot.lane.b32.xlu1 %v346_v33, %s2519_s29 }
  0xa4   : > { %555 = vrot.lane.b32.xlu0 %v545_v35, %s2518_s23 }
  0xa6   : > { %553 = vrot.lane.b32.xlu1 %v550_v37, %s2518_s23 }
  0xa8   : > { %658 = vrot.lane.b32.xlu0 %v655_v38, %s2517_s22 }
  0xaa   : > { %551 = vrot.lane.b32.xlu1 %v544_v32, %s2518_s23 }
  0xac   : > { %656 = vrot.lane.b32.xlu0 %v649_v34, %s2517_s22 }
  0xae   : > { %660 = vrot.lane.b32.xlu1 %v650_v42, %s2517_s22 }
  0xb0   : > { %756 = vrot.lane.b32.xlu0 %v746_v45, %s2513_s18 }
  0xb2   : > { %754 = vrot.lane.b32.xlu1 %v352_v25, %s2513_s18 }
  0xb4   : > { %857 = vrot.lane.b32.xlu0 %v854_v47, %s2516_s21 }
  0xb6   : > { %752 = vrot.lane.b32.xlu1 %v2652_v22, %s2513_s18 }
  0xb8   : > { %855 = vrot.lane.b32.xlu0 %v848_v43, %s2516_s21 }
  0xba   : > { %859 = vrot.lane.b32.xlu1 %v849_v51, %s2516_s21 }
  0xbc   : > { %962 = vrot.lane.b32.xlu0 %v952_v53, %s2514_s19 }
  0xbe   : > { %960 = vrot.lane.b32.xlu1 %v957_v55, %s2514_s19 }
  0xc0   : > { %1055 = vrot.lane.b32.xlu0 %v352_v25, %s2521_s9 }
  0xc2   : > { %958 = vrot.lane.b32.xlu1 %v951_v50, %s2514_s19 }
  0xc4   : > { %1053 = vrot.lane.b32.xlu0 %v2652_v22, %s2521_s9 }
  0xc6   : > { %1057 = vrot.lane.b32.xlu1 %v1047_v60, %s2521_s9 }
  0xc8   : > { %1161 = vrot.lane.b32.xlu0 %v1151_v61, %s2515_s20 }
  0xca   : > { %1159 = vrot.lane.b32.xlu1 %v1156_v62, %s2515_s20 }
  0xce   : > { %1157 = vrot.lane.b32.xlu1 %v1150_v58, %s2515_s20 }
 0x109   : > { %v358_v63 = vpop.permute.xlu0 %357 }
 0x10c   : > { %v356_v0 = vpop.permute.xlu1 %355 }
 0x10d   : > { %v361_v2 = vsel %vm359_vm15, %v356_v0, %v358_v63 }
 0x10e   : > { %v448_v3 = vpop.permute.xlu0 %447  ;;  %2282 = vmatprep.subr.msk.mxu0 %vm366_vm1, %v361_v2  ;;  %v2308_v2 = vld [vmem:[%s3007_s1 + $0x1c] sm:$0xf] }
 0x110   : > { %v354_v4 = vpop.permute.xlu1 %353 }
 0x111   : > { %v360_v7 = vsel %vm359_vm15, %v354_v4, %v356_v0  ;;  %v2312_v4 = vld [vmem:[%s3007_s1 + $0x20] sm:$0xf] }
 0x112   : > { %v446_v8 = vpop.permute.xlu0 %445  ;;  %2283 = vmatpush1.msk.msra.mxu0 %vm366_vm1, %v360_v7 }
 0x113   : > { %2284 = vmatmul.mubr.msk.f32.vlgmr.msra.gmra.mrb[0].mxu0 %vm362_vm2, %v2281_v6  ;;  %v452_v12 = vsel %vm451_vm14, %v446_v8, %v448_v3 }
 0x114   : > { %v450_v9 = vpop.permute.xlu1 %449  ;;  %525 = vmatprep.mubr.f32.mxu0 %v2512_v1 }
 0x115   : > { %v453_v10 = vsel %vm451_vm14, %v448_v3, %v450_v9 }
 0x116   : > { %v556_v11 = vpop.permute.xlu0 %555  ;;  %2285 = vmatprep.subr.msk.mxu0 %vm366_vm1, %v453_v10 }
 0x117   : > { %2286 = vmatpush1.msk.msra.mxu0 %vm366_vm1, %v452_v12  ;;  %v2522_v12 = vmov 0  }
 0x118   : > { %v554_v13 = vpop.permute.xlu1 %553  ;;  %2440 = vset.pattern.permute.xlu0 %v2522_v12  ;;  %2441 = vset.pattern.permute.xlu1 %v2522_v12 }
 0x119   : > { %v559_v16 = vsel %vm557_vm13, %v554_v13, %v556_v11  ;;  %v1265_v11 = vld [vmem:[%s3008_s2] sm:$0xf] }
 0x11a   : > { %v659_v17 = vpop.permute.xlu0 %658  ;;  %2289 = vmatprep.subr.msk.mxu0 %vm366_vm1, %v559_v16 }
 0x11b   : > { %2287 = vmatmul.mubr.msk.f32.vlgmr.msra.gmra.mrb[0].mxu0 %vm362_vm2, %v347_v15 }
 0x11c   : > { %v552_v18 = vpop.permute.xlu1 %551  ;;  %631 = vmatprep.mubr.f32.mxu0 %v2512_v1 }
 0x11d   : > { %v558_v21 = vsel %vm557_vm13, %v552_v18, %v554_v13 }
 0x11e   : > { %v657_v22 = vpop.permute.xlu0 %656  ;;  %2290 = vmatpush1.msk.msra.mxu0 %vm366_vm1, %v558_v21 }
 0x11f   : > { %v663_v31 = vsel %vm662_vm12, %v657_v22, %v659_v17 }
 0x120   : > { %v661_v23 = vpop.permute.xlu1 %660 }
 0x121   : > { %v664_v25 = vsel %vm662_vm12, %v659_v17, %v661_v23 }
 0x122   : > { %v757_v27 = vpop.permute.xlu0 %756  ;;  %2293 = vmatprep.subr.msk.mxu0 %vm366_vm1, %v664_v25  ;;  %v1273_v25 = vld [vmem:[%s3009_s3] sm:$0xf] }
 0x123   : > { %2291 = vmatmul.mubr.msk.f32.vlgmr.msra.gmra.mrb[0].mxu0 %vm362_vm2, %v2288_v24 }
 0x124   : > { %2294 = vmatpush1.msk.msra.mxu0 %vm366_vm1, %v663_v31  ;;  %v755_v32 = vpop.permute.xlu1 %754  ;;  %736 = vmatprep.mubr.f32.mxu0 %v2512_v1 }
 0x125   : > { %v759_v33 = vsel %vm325_vm7, %v755_v32, %v757_v27 }
 0x126   : > { %v858_v34 = vpop.permute.xlu0 %857  ;;  %2297 = vmatprep.subr.msk.mxu0 %vm366_vm1, %v759_v33 }
 0x128   : > { %v753_v35 = vpop.permute.xlu1 %752 }
 0x129   : > { %v758_v37 = vsel %vm325_vm7, %v753_v35, %v755_v32 }
 0x12a   : > { %v856_v38 = vpop.permute.xlu0 %855 }
 0x12b   : > { %2295 = vmatmul.mubr.msk.f32.vlgmr.msra.gmra.mrb[0].mxu0 %vm362_vm2, %v2292_v36  ;;  %v861_v47 = vsel %vm645_vm11, %v856_v38, %v858_v34 }
 0x12c   : > { %2298 = vmatpush1.msk.msra.mxu0 %vm366_vm1, %v758_v37  ;;  %v860_v40 = vpop.permute.xlu1 %859  ;;  %831 = vmatprep.mubr.f32.mxu0 %v2512_v1 }
 0x12d   : > { %v862_v42 = vsel %vm645_vm11, %v858_v34, %v860_v40 }
 0x12e   : > { %2301 = vmatprep.subr.msk.mxu0 %vm366_vm1, %v862_v42  ;;  %v963_v45 = vpop.permute.xlu0 %962 }
 0x130   : > { %v961_v43 = vpop.permute.xlu1 %960 }
 0x131   : > { %v965_v49 = vsel %vm540_vm10, %v961_v43, %v963_v45 }
 0x132   : > { %v1056_v51 = vpop.permute.xlu0 %1055 }
 0x133   : > { %2299 = vmatmul.mubr.msk.f32.vlgmr.msra.gmra.mrb[0].mxu0 %vm362_vm2, %v2296_v44 }
 0x134   : > { %2302 = vmatpush1.msk.msra.mxu0 %vm366_vm1, %v861_v47  ;;  %v959_v50 = vpop.permute.xlu1 %958  ;;  %934 = vmatprep.mubr.f32.mxu0 %v2512_v1 }
 0x135   : > { %2305 = vmatprep.subr.msk.mxu0 %vm366_vm1, %v965_v49  ;;  %v964_v54 = vsel %vm540_vm10, %v959_v50, %v961_v43 }
 0x136   : > { %v1054_v58 = vpop.permute.xlu0 %1053 }
 0x137   : > { %v1060_v61 = vsel %vm1059_vm3, %v1054_v58, %v1056_v51 }
 0x138   : > { %v1058_v53 = vpop.permute.xlu1 %1057 }
 0x139   : > { %v1061_v55 = vsel %vm1059_vm3, %v1056_v51, %v1058_v53 }
 0x13a   : > { %v1162_v62 = vpop.permute.xlu0 %1161 }
 0x13b   : > { %2303 = vmatmul.mubr.msk.f32.vlgmr.msra.gmra.mrb[0].mxu0 %vm362_vm2, %v2300_v52 }
 0x13c   : > { %2306 = vmatpush1.msk.msra.mxu0 %vm366_vm1, %v964_v54  ;;  %1037 = vmatprep.mubr.f32.mxu0 %v2512_v1  ;;  %v1160_v60 = vpop.permute.xlu1 %1159 }
 0x13d   : > { %2309 = vmatprep.subr.msk.mxu0 %vm366_vm1, %v1061_v55  ;;  %v1164_v63 = vsel %vm341_vm9, %v1160_v60, %v1162_v62 }
 0x140   : > { %v1158_v0 = vpop.permute.xlu1 %1157 }
 0x141   : > { %v1163_v3 = vsel %vm341_vm9, %v1158_v0, %v1160_v60 }
 0x143   : > { %2307 = vmatmul.mubr.msk.f32.vlgmr.msra.gmra.mrb[0].mxu0 %vm362_vm2, %v2304_v59 }
 0x144   : > { %2310 = vmatpush1.msk.msra.mxu0 %vm366_vm1, %v1060_v61  ;;  %1133 = vmatprep.mubr.f32.mxu0 %v2512_v1 }
 0x145   : > { %2313 = vmatprep.subr.msk.mxu0 %vm366_vm1, %v1164_v63 }
 0x14b   : > { %2311 = vmatmul.mubr.msk.f32.vlgmr.msra.gmra.mrb[0].mxu0 %vm362_vm2, %v2308_v2 }
 0x14c   : > { %2314 = vmatpush1.msk.msra.mxu0 %vm366_vm1, %v1163_v3  ;;  %1236 = vmatprep.mubr.f32.mxu0 %v2512_v1 }
 0x153   : > { %2315 = vmatmul.mubr.msk.f32.vlgmr.msra.gmra.mrb[0].mxu0 %vm362_vm2, %v2312_v4 }
 0x226   : > { %v1238_v6 = vpop.f32.mrb[0].mxu0 }
 0x227   : > { %v1245_v7 = vsel %vm366_vm1, %v1238_v6, 0.0  ;;  %v1240_v8 = vpop.f32.mrb[1].mxu0 }
 0x228   : > { %v1246_v9 = vsel %vm366_vm1, %v1240_v8, 0.0 }
 0x229   : > { %v1247_v10 = vadd.f32 %v1246_v9, %v1245_v7 }
 0x22b   : > { %1248 = vadd.xlane.f32.xlu0 %v1247_v10 }
 0x241   : > { %1268 = vperm.xlu0 %2440, %v1265_v11  }
 0x2b8   : > { %v1249_v13 = vpop.xlane.xlu0 %1248 }
 0x2b9   : > { %v1250_v15 = vmul.f32 0.00390625, %v1249_v13 }
 0x2bb   : > { %v1251_v16 = vsub.f32 %v1238_v6, %v1250_v15  ;;  %v1252_v17 = vsub.f32 %v1240_v8, %v1250_v15 }
 0x2bd   : > { %v1253_v18 = vmul.f32 %v1251_v16, %v1251_v16  ;;  %v1254_v21 = vmul.f32 %v1252_v17, %v1252_v17 }
 0x2bf   : > { %v1255_v22 = vsel %vm366_vm1, %v1253_v18, 0.0  ;;  %v1256_v23 = vsel %vm366_vm1, %v1254_v21, 0.0 }
 0x2c0   : > { %v1257_v24 = vadd.f32 %v1256_v23, %v1255_v22  ;;  %v1269_v34 = vpop.permute.xlu0 %1268  ;;  %v1298_v22 = vld [vmem:[%s3010_s4] sm:$0xf] }
 0x2c2   : > { %1258 = vadd.xlane.f32.xlu1 %v1257_v24 }
 0x2d3   : > { %1276 = vperm.xlu1 %2441, %v1273_v25  }
 0x34f   : > { %v1259_v27 = vpop.xlane.xlu1 %1258 }
 0x350   : > { %v1260_v31 = vmul.f32 0.00390625, %v1259_v27 }
 0x352   : > { %v1261_v32 = vadd.f32 1e-05, %v1260_v31 }
 0x353   : > { %v1277_v37 = vpop.permute.xlu1 %1276 }
 0x354   : > { %2444 = vrsqrt.f32 %v1261_v32 }
 0x35e   : > { %v2445_v33 = vpop.eup %2444 }
 0x35f   : > { %v1263_v35 = vmul.f32 %v2445_v33, %v1251_v16  ;;  %v1264_v36 = vmul.f32 %v2445_v33, %v1252_v17 }
 0x361   : > { %v1271_v38 = vmul.f32 %v1269_v34, %v1263_v35  ;;  %v1272_v40 = vmul.f32 %v1269_v34, %v1264_v36  ;;  %v2323_v34 = vld [vmem:[%s3010_s4 + $0x8] sm:$0xf] }
 0x363   : > { %v1279_v42 = vadd.f32 %v1277_v37, %v1271_v38  ;;  %v1280_v43 = vadd.f32 %v1277_v37, %v1272_v40 }
 0x365   : > { %v1281_v44 = vmax.f32 %v1279_v42, 0.0  ;;  %v1282_v45 = vmax.f32 %v1280_v43, 0.0  ;;  %v2327_v43 = vld [vmem:[%s3010_s4 + $0xc] sm:$0xf] }
 0x367   : > { %v1285_v47 = vcombine.low %v1281_v44, %v1282_v45 }
 0x369   : > { %1286 = vrot.lane.b32.xlu1 %v1285_v47, %s2513_s18 }
 0x3db   : > { %v1287_v49 = vpop.permute.xlu1 %1286 }
 0x3dc   : > { %v1288_v50 = vrot.slane %v1287_v49, 4 }
 0x3de   : > { %v1289_v51 = vsel %vm325_vm7, %v1288_v50, %v1287_v49  ;;  %1293 = vst.msk [vmem:[#allocation2 + $0x8] sm:$0xf] %vm316_vm0, %v1288_v50 }
 0x3df   : > { %1292 = vst.msk [vmem:[#allocation2] sm:$0xff] %vm2638_vm8, %v1289_v51  ;;  %v2331_v51 = vld [vmem:[%s3010_s4 + $0x10] sm:$0xf] }
 0x3e5   : > { %v1295_v52 = vld [vmem:[#allocation2 + $0x8] sm:$0xf] }
 0x3e6   : > { %1308 = vrot.lane.b32.xlu1 %v1295_v52, %s2520_s8  ;;  %v1294_v53 = vld [vmem:[#allocation2] sm:$0xff]  ;;  %v1480_v55 = vld [vmem:[#allocation2 + $0x8] sm:$0xf] }
 0x3e7   : > { %v1296_v54 = vmul.f32 %v1294_v53, %v2650_v20  ;;  %v1482_v58 = vmul.f32 %v1480_v55, %v2659_v26  ;;  %v1578_v59 = vmul.f32 %v1294_v53, %v2671_v30  ;;  %v1303_v60 = vcombine.high %v1294_v53, %v1294_v53  ;;  %v1674_v30 = vld [vmem:[#allocation2 + $0x8] sm:$0xf] }
 0x3e8   : > { %v1297_v20 = vmul.f32 %v1295_v52, %v2646_v19  ;;  %v1481_v62 = vmul.f32 %v1294_v53, %v2667_v29  ;;  %v1770_v26 = vmul.f32 %v1294_v53, %v2690_v41  ;;  %v1577_v2 = vld [vmem:[#allocation2 + $0x8] sm:$0xf]  ;;  %v2059_v8 = vmul.f32 %v1294_v53, %v2722_v57  ;;  %v2316_v57 = vld [vmem:[%s3010_s4 + $0x4] sm:$0xf] }
 0x3e9   : > { %1393 = vrot.lane.b32.xlu0 %v1296_v54, %s2519_s29  ;;  %v1584_v14 = vcombine.high %v1578_v59, %v1578_v59  ;;  %v1392_v61 = vcombine.high %v1296_v54, %v1296_v54  ;;  %v1579_v19 = vmul.f32 %v1577_v2, %v2661_v28  ;;  %v1866_v29 = vld [vmem:[#allocation2 + $0x8] sm:$0xf]  ;;  %v1867_v28 = vmul.f32 %v1294_v53, %v2705_v48 }
 0x3ea   : > { %1304 = vrot.lane.b32.xlu1 %v1294_v53, %s2520_s8  ;;  %v1487_v63 = vcombine.high %v1481_v62, %v1481_v62  ;;  %v1776_v0 = vcombine.high %v1770_v26, %v1770_v26  ;;  %v1868_v41 = vmul.f32 %v1866_v29, %v2699_v46  ;;  %v1769_v3 = vld [vmem:[#allocation2 + $0x8] sm:$0xf]  ;;  %v2343_v29 = vld [vmem:[%s3010_s4 + $0x1c] sm:$0xf] }
 0x3eb   : > { %v1771_v4 = vmul.f32 %v1769_v3, %v2684_v39  ;;  %v2058_v6 = vld [vmem:[#allocation2 + $0x8] sm:$0xf]  ;;  %v1873_v7 = vcombine.high %v1867_v28, %v1867_v28  ;;  %v2065_v39 = vcombine.high %v2059_v8, %v2059_v8  ;;  %v2347_v3 = vld [vmem:[%s3010_s4 + $0x20] sm:$0xf] }
 0x3ec   : > { %v2060_v46 = vmul.f32 %v2058_v6, %v2716_v56  ;;  %v1963_v9 = vld [vmem:[#allocation2 + $0x8] sm:$0xf] }
 0x3ed   : > { %1492 = vrot.lane.b32.xlu0 %v1482_v58, %s2518_s23 }
 0x3ee   : > { %1306 = vrot.lane.b32.xlu1 %v1303_v60, %s2520_s8 }
 0x3f1   : > { %1587 = vrot.lane.b32.xlu0 %v1584_v14, %s2517_s22 }
 0x3f2   : > { %1395 = vrot.lane.b32.xlu1 %v1392_v61, %s2519_s29 }
 0x3f5   : > { %1585 = vrot.lane.b32.xlu0 %v1578_v59, %s2517_s22 }
 0x3f6   : > { %1397 = vrot.lane.b32.xlu1 %v1297_v20, %s2519_s29 }
 0x3f9   : > { %1684 = vrot.lane.b32.xlu0 %v1674_v30, %s2513_s18 }
 0x3fa   : > { %1490 = vrot.lane.b32.xlu1 %v1487_v63, %s2518_s23 }
 0x3fd   : > { %1779 = vrot.lane.b32.xlu0 %v1776_v0, %s2516_s21 }
 0x3fe   : > { %1488 = vrot.lane.b32.xlu1 %v1481_v62, %s2518_s23 }
 0x401   : > { %1777 = vrot.lane.b32.xlu0 %v1770_v26, %s2516_s21  ;;  %v2339_v26 = vld [vmem:[%s3010_s4 + $0x18] sm:$0xf] }
 0x402   : > { %1589 = vrot.lane.b32.xlu1 %v1579_v19, %s2517_s22  ;;  %s2452_s22 = sshll.u32 %s2523_s28, 4  ;;  %s2453_s22 = int_to_ptr.vmem [resolvable:$false] %s2452_s22 }
 0x403   : > { %s2454_s23 = scalar_lea.vmem %s2453_s22, 256 }
 0x405   : > { %1878 = vrot.lane.b32.xlu0 %v1868_v41, %s2514_s19 }
 0x406   : > { %1682 = vrot.lane.b32.xlu1 %v1303_v60, %s2513_s18 }
 0x409   : > { %1971 = vrot.lane.b32.xlu0 %v1303_v60, %s2521_s9  ;;  %v2335_v60 = vld [vmem:[%s3010_s4 + $0x14] sm:$0xf] }
 0x40a   : > { %1680 = vrot.lane.b32.xlu1 %v1294_v53, %s2513_s18 }
 0x40d   : > { %1969 = vrot.lane.b32.xlu0 %v1294_v53, %s2521_s9 }
 0x40e   : > { %1781 = vrot.lane.b32.xlu1 %v1771_v4, %s2516_s21 }
 0x411   : > { %2070 = vrot.lane.b32.xlu0 %v2060_v46, %s2515_s20 }
 0x412   : > { %1876 = vrot.lane.b32.xlu1 %v1873_v7, %s2514_s19 }
 0x416   : > { %1874 = vrot.lane.b32.xlu1 %v1867_v28, %s2514_s19  ;;  %s2964_s19 = scalar_lea.hbm %s3013_s7, %s2357_s16 }
 0x41a   : > { %1973 = vrot.lane.b32.xlu1 %v1963_v9, %s2521_s9  ;;  %s269_s9 = sand.u32 1, %s2502_s25  }
 0x41b   : > { %s2274_s15 = sshll.u32 %s269_s9, 3 }
 0x41c   : > { %s271_s17 = scalar_lea.vmem [#allocation3], %s2274_s15 }
 0x41d   : > { %s2211_s13 = sshll.u32 %s271_s17, 4  ;;  %s2966_s13 = int_to_ptr.vmem [resolvable:$true] %s2211_s13 }
 0x41e   : > { %2068 = vrot.lane.b32.xlu1 %v2065_v39, %s2515_s20  ;;  %s2448_s21 = scalar_lea.vmem %s2966_s13, 128  ;;  %p2455_p0 = scmp.lt.s32.totalorder %s2966_s13, %s2453_s22 }
 0x41f   : > { %p2449_p11 = scmp.ne.s32.totalorder %s2966_s13, %s2448_s21  ;;  %p2456_p1 = scmp.lt.s32.totalorder %s2454_s23, %s2448_s21 }
 0x421   : > { %p2450_p12 = pnand %p2449_p11, %p2602_p5  ;;  %p2457_p2 = por %p2456_p1, %p2455_p0 }
 0x422   : > { %2066 = vrot.lane.b32.xlu1 %v2059_v8, %s2515_s20  ;;  %v2174_v8 = vld [vmem:[%s3011_s5] sm:$0xf]  ;;  %s2197_s20 = scalar_lea.sflag [#allocation4], %s269_s9 }
 0x423   : > { %p2451_p13 = pneg %p2450_p12 }
 0x425   : > { %p2458_p3 = pnand %p2457_p2, %p2451_p13 }
 0x458   : > { %v1309_v48 = vpop.permute.xlu1 %1308 }
 0x45b   : > { %v1394_v10 = vpop.permute.xlu0 %1393 }
 0x45c   : > { %v1305_v56 = vpop.permute.xlu1 %1304 }
 0x45f   : > { %v1493_v11 = vpop.permute.xlu0 %1492 }
 0x460   : > { %v1307_v12 = vpop.permute.xlu1 %1306 }
 0x461   : > { %v1311_v13 = vsel %vm359_vm15, %v1307_v12, %v1309_v48  ;;  %v1310_v15 = vsel %vm359_vm15, %v1305_v56, %v1307_v12 }
 0x462   : > { %2317 = vmatprep.subr.msk.mxu1 %vm366_vm1, %v1311_v13 }
 0x463   : > { %2318 = vmatpush1.msk.msra.mxu1 %vm366_vm1, %v1310_v15  ;;  %v1588_v16 = vpop.permute.xlu0 %1587  ;;  %v2182_v15 = vld [vmem:[%s3012_s6] sm:$0xf] }
 0x464   : > { %2319 = vmatmul.mubr.msk.f32.vlgmr.msra.gmra.mrb[0].mxu1 %vm362_vm2, %v2316_v57  ;;  %v1396_v17 = vpop.permute.xlu1 %1395 }
 0x465   : > { %1472 = vmatprep.mubr.f32.mxu1 %v2512_v1  ;;  %v1399_v23 = vsel %vm451_vm14, %v1394_v10, %v1396_v17 }
 0x467   : > { %v1586_v24 = vpop.permute.xlu0 %1585 }
 0x468   : > { %v1398_v18 = vpop.permute.xlu1 %1397  ;;  %v1591_v37 = vsel %vm662_vm12, %v1586_v24, %v1588_v16 }
 0x469   : > { %v1400_v21 = vsel %vm451_vm14, %v1396_v17, %v1398_v18 }
 0x46a   : > { %2320 = vmatprep.subr.msk.mxu1 %vm366_vm1, %v1400_v21 }
 0x46b   : > { %2321 = vmatpush1.msk.msra.mxu1 %vm366_vm1, %v1399_v23  ;;  %v1685_v31 = vpop.permute.xlu0 %1684 }
 0x46c   : > { %2322 = vmatmul.mubr.msk.f32.vlgmr.msra.gmra.mrb[0].mxu1 %vm362_vm2, %v1298_v22  ;;  %v1491_v25 = vpop.permute.xlu1 %1490 }
 0x46d   : > { %v1495_v27 = vsel %vm557_vm13, %v1491_v25, %v1493_v11  ;;  %1567 = vmatprep.mubr.f32.mxu1 %v2512_v1 }
 0x46e   : > { %2324 = vmatprep.subr.msk.mxu1 %vm366_vm1, %v1495_v27 }
 0x46f   : > { %v1780_v38 = vpop.permute.xlu0 %1779 }
 0x470   : > { %v1489_v32 = vpop.permute.xlu1 %1488 }
 0x471   : > { %v1494_v33 = vsel %vm557_vm13, %v1489_v32, %v1491_v25 }
 0x472   : > { %2325 = vmatpush1.msk.msra.mxu1 %vm366_vm1, %v1494_v33 }
 0x473   : > { %v1778_v44 = vpop.permute.xlu0 %1777 }
 0x474   : > { %2326 = vmatmul.mubr.msk.f32.vlgmr.msra.gmra.mrb[0].mxu1 %vm362_vm2, %v2323_v34  ;;  %v1590_v35 = vpop.permute.xlu1 %1589  ;;  %v1783_v53 = vsel %vm645_vm11, %v1778_v44, %v1780_v38 }
 0x475   : > { %v1592_v36 = vsel %vm662_vm12, %v1588_v16, %v1590_v35  ;;  %1664 = vmatprep.mubr.f32.mxu1 %v2512_v1 }
 0x476   : > { %2328 = vmatprep.subr.msk.mxu1 %vm366_vm1, %v1592_v36 }
 0x477   : > { %2329 = vmatpush1.msk.msra.mxu1 %vm366_vm1, %v1591_v37  ;;  %v1879_v52 = vpop.permute.xlu0 %1878 }
 0x478   : > { %v1683_v40 = vpop.permute.xlu1 %1682 }
 0x479   : > { %v1687_v42 = vsel %vm325_vm7, %v1683_v40, %v1685_v31 }
 0x47a   : > { %2332 = vmatprep.subr.msk.mxu1 %vm366_vm1, %v1687_v42 }
 0x47b   : > { %v1972_v58 = vpop.permute.xlu0 %1971 }
 0x47c   : > { %2330 = vmatmul.mubr.msk.f32.vlgmr.msra.gmra.mrb[0].mxu1 %vm362_vm2, %v2327_v43  ;;  %v1681_v45 = vpop.permute.xlu1 %1680 }
 0x47d   : > { %v1686_v47 = vsel %vm325_vm7, %v1681_v45, %v1683_v40  ;;  %1759 = vmatprep.mubr.f32.mxu1 %v2512_v1 }
 0x47e   : > { %2333 = vmatpush1.msk.msra.mxu1 %vm366_vm1, %v1686_v47 }
 0x47f   : > { %v1970_v62 = vpop.permute.xlu0 %1969 }
 0x480   : > { %v1782_v49 = vpop.permute.xlu1 %1781  ;;  %v1975_v63 = vsel %vm1059_vm3, %v1970_v62, %v1972_v58 }
 0x481   : > { %v1784_v50 = vsel %vm645_vm11, %v1780_v38, %v1782_v49 }
 0x482   : > { %2336 = vmatprep.subr.msk.mxu1 %vm366_vm1, %v1784_v50 }
 0x483   : > { %v2071_v0 = vpop.permute.xlu0 %2070 }
 0x484   : > { %2334 = vmatmul.mubr.msk.f32.vlgmr.msra.gmra.mrb[0].mxu1 %vm362_vm2, %v2331_v51  ;;  %v1877_v54 = vpop.permute.xlu1 %1876 }
 0x485   : > { %2337 = vmatpush1.msk.msra.mxu1 %vm366_vm1, %v1783_v53  ;;  %v1881_v55 = vsel %vm540_vm10, %v1877_v54, %v1879_v52  ;;  %1856 = vmatprep.mubr.f32.mxu1 %v2512_v1 }
 0x486   : > { %2340 = vmatprep.subr.msk.mxu1 %vm366_vm1, %v1881_v55 }
 0x488   : > { %v1875_v59 = vpop.permute.xlu1 %1874 }
 0x489   : > { %v1880_v14 = vsel %vm540_vm10, %v1875_v59, %v1877_v54 }
 0x48c   : > { %2338 = vmatmul.mubr.msk.f32.vlgmr.msra.gmra.mrb[0].mxu1 %vm362_vm2, %v2335_v60  ;;  %v1974_v61 = vpop.permute.xlu1 %1973 }
 0x48d   : > { %2341 = vmatpush1.msk.msra.mxu1 %vm366_vm1, %v1880_v14  ;;  %v1976_v20 = vsel %vm1059_vm3, %v1972_v58, %v1974_v61  ;;  %1953 = vmatprep.mubr.f32.mxu1 %v2512_v1 }
 0x48e   : > { %2344 = vmatprep.subr.msk.mxu1 %vm366_vm1, %v1976_v20 }
 0x490   : > { %v2069_v30 = vpop.permute.xlu1 %2068 }
 0x491   : > { %v2073_v2 = vsel %vm341_vm9, %v2069_v30, %v2071_v0 }
 0x494   : > { %2342 = vmatmul.mubr.msk.f32.vlgmr.msra.gmra.mrb[0].mxu1 %vm362_vm2, %v2339_v26  ;;  %v2067_v19 = vpop.permute.xlu1 %2066 }
 0x495   : > { %2345 = vmatpush1.msk.msra.mxu1 %vm366_vm1, %v1975_v63  ;;  %2048 = vmatprep.mubr.f32.mxu1 %v2512_v1  ;;  %v2072_v41 = vsel %vm341_vm9, %v2067_v19, %v2069_v30 }
 0x496   : > { %2348 = vmatprep.subr.msk.mxu1 %vm366_vm1, %v2073_v2 }
 0x49c   : > { %2346 = vmatmul.mubr.msk.f32.vlgmr.msra.gmra.mrb[0].mxu1 %vm362_vm2, %v2343_v29 }
 0x49d   : > { %2349 = vmatpush1.msk.msra.mxu1 %vm366_vm1, %v2072_v41  ;;  %2145 = vmatprep.mubr.f32.mxu1 %v2512_v1 }
 0x4a4   : > { %2350 = vmatmul.mubr.msk.f32.vlgmr.msra.gmra.mrb[0].mxu1 %vm362_vm2, %v2347_v3 }
 0x577   : > { %v2147_v4 = vpop.f32.mrb[0].mxu1 }
 0x578   : > { %v2154_v6 = vsel %vm366_vm1, %v2147_v4, 0.0  ;;  %v2149_v28 = vpop.f32.mrb[1].mxu1 }
 0x579   : > { %v2155_v46 = vsel %vm366_vm1, %v2149_v28, 0.0 }
 0x57a   : > { %v2156_v7 = vadd.f32 %v2155_v46, %v2154_v6 }
 0x57c   : > { %2157 = vadd.xlane.f32.xlu0 %v2156_v7 }
 0x592   : > { %2177 = vperm.xlu0 %2440, %v2174_v8  }
 0x609   : > { %v2158_v1 = vpop.xlane.xlu0 %2157 }
 0x60a   : > { %v2159_v9 = vmul.f32 0.00390625, %v2158_v1 }
 0x60c   : > { %v2160_v39 = vsub.f32 %v2147_v4, %v2159_v9  ;;  %v2161_v48 = vsub.f32 %v2149_v28, %v2159_v9 }
 0x60e   : > { %v2162_v10 = vmul.f32 %v2160_v39, %v2160_v39  ;;  %v2163_v56 = vmul.f32 %v2161_v48, %v2161_v48 }
 0x610   : > { %v2164_v11 = vsel %vm366_vm1, %v2162_v10, 0.0  ;;  %v2165_v12 = vsel %vm366_vm1, %v2163_v56, 0.0 }
 0x611   : > { %v2166_v13 = vadd.f32 %v2165_v12, %v2164_v11  ;;  %v2178_v23 = vpop.permute.xlu0 %2177 }
 0x613   : > { %2167 = vadd.xlane.f32.xlu1 %v2166_v13 }
 0x624   : > { %2185 = vperm.xlu1 %2441, %v2182_v15  }
 0x6a0   : > { %v2168_v57 = vpop.xlane.xlu1 %2167 }
 0x6a1   : > { %v2169_v16 = vmul.f32 0.00390625, %v2168_v57 }
 0x6a3   : > { %v2170_v17 = vadd.f32 1e-05, %v2169_v16 }
 0x6a4   : > { %v2186_v27 = vpop.permute.xlu1 %2185 }
 0x6a5   : > { %2446 = vrsqrt.f32 %v2170_v17 }
 0x6af   : > { %v2447_v18 = vpop.eup %2446 }
 0x6b0   : > { %v2172_v21 = vmul.f32 %v2447_v18, %v2160_v39  ;;  %v2173_v22 = vmul.f32 %v2447_v18, %v2161_v48 }
 0x6b2   : > { %v2180_v24 = vmul.f32 %v2178_v23, %v2172_v21  ;;  %v2181_v25 = vmul.f32 %v2178_v23, %v2173_v22 }
 0x6b4   : > { %v2188_v31 = vadd.f32 %v2186_v27, %v2180_v24  ;;  %v2189_v32 = vadd.f32 %v2186_v27, %v2181_v25 }
 0x6b6   : > { %v2192_v33 = vcombine.low %v2188_v31, %v2189_v32 }
 0x6b8   : > { %v2194_v34 = vadd.f32 %v2192_v33, %v2623_v5 }
 0x6ba   : > { %2195 = vst [vmem:[%s271_s17] sm:$0xff] %v2194_v34 }
 0x6bb   : > { %2461 = shalt.err (!%p2458_p3)
}
 0x6bc   : > { %s2462_s29 = scalar_lea.hbm %s2964_s19, 128  ;;  %s2466_s15 = scalar_lea.hbm %s3013_s7, 256 }
 0x6bd   : > { %p2463_p4 = scmp.ne.s32.totalorder %s2964_s19, %s2462_s29  ;;  %p2467_p9 = scmp.lt.u32.totalorder %s2964_s19, %s3013_s7 }
 0x6be   : > { %p2468_p10 = scmp.lt.u32.totalorder %s2466_s15, %s2462_s29  ;;  %p2470_p12 = scmp.lt.u32.totalorder %s2462_s29, %s2964_s19 }
 0x6bf   : > { %p2464_p7 = pnand %p2463_p4, %p2602_p5 }
 0x6c0   : > { %p2469_p11 = por %p2468_p10, %p2467_p9 }
 0x6c1   : > { %p2465_p8 = pneg %p2464_p7 }
 0x6c2   : > { %p2471_p13 = por %p2470_p12, %p2469_p11 }
 0x6c4   : > { %p2472_p0 = pnand %p2471_p13, %p2465_p8 }
 0x6c6   : > { %2475 = shalt.err (!%p2472_p0)
}
 0x6c7   : > { %2390 = dma.vmem_to_hbm [thread:$0]  (%p2602_p5), %s2966_s13, 128, %s2964_s19, %s2197_s20  }
 0x6c8 PF: > { %p2396_p1 = scmp.ge.s32.totalorder %s2510_s27, 2  ;;  %s2223_s14 = sand.u32 1, %s2498_s24  }
 0x6c9   : > { %s2224_s18 = scalar_lea.sflag [#allocation4], %s2223_s14 }
 0x6ca   : > { %p2393_p2 = pnand %p2396_p1, %p2606_p6 }
 0x6cc   : > { %2493 = dma.done.wait (!%p2393_p2), %s2224_s18, 128  }
 0x6cd   : > { %2495 = vsyncadd (!%p2393_p2), %s2224_s18, 4294967168  ;;  %p17_p3 = scmp.ge.s32.totalorder %s2589_s30, 4   ;;  %s3018_s24 = smov %s2502_s25 }
 0x6ce   : > { %s3019_s25 = smov %s2506_s26  ;;  %s3020_s26 = smov %s2600_s10 }
 0x6cf   : > { %s3021_s27 = smov %s2589_s30  ;;  %19 = sbr.rel (!%p17_p3) target bundleno = 3 (0x3), region = 99 }
 0x6d6   :  { %2229 = vsyncpa [#allocation4], 1 }
 0x6d7   :  { %2231 = vsyncpa [#allocation4 + $0x1], 1 }

</bundles_post_ra>
